<compile_context>
chip_gen: v5e
topology: v5e:2x2
jax: 0.10.0
libtpu: 0.0.40
codegen_flags: <defaults>
</compile_context>

<pallas_src>
import functools

import jax
import jax.numpy as jnp
from jax.experimental import pallas as pl
from jax.experimental.pallas import tpu as pltpu


_LANE = 128
_SUBLANE = 8


def _round_up(n, m):
    return ((n + m - 1) // m) * m


def _pad2d(a, shape):
    pr = shape[0] - a.shape[0]
    pc = shape[1] - a.shape[1]
    if pr == 0 and pc == 0:
        return a
    return jnp.pad(a, ((0, pr), (0, pc)))


def _vmem_capacity_bytes():
    """Generation-aware VMEM capacity (64 MiB/TC on v7x, 128 MiB on v5e/v6e)."""
    try:
        info = pltpu.get_tpu_info()
        cap = getattr(info, "vmem_capacity_bytes", None)
        if cap:
            return int(cap)
    except Exception:
        pass
    return 64 * 1024 * 1024  # conservative fallback (v7x per-TensorCore)


def _supports_pipeline_mode():
    """Probe whether this JAX build accepts BlockSpec(pipeline_mode=pl.Buffered(n))."""
    try:
        pl.BlockSpec((8, 128), lambda i: (0, 0), pipeline_mode=pl.Buffered(1))
        return True
    except Exception:
        return False


# ---------------------------------------------------------------------------
# Kernel A: batch-independent Gumbel-softmax mask (runs exactly once)
#   m = softmax((alpha + g) / T, dim=0),  g = -log(-log(U + eps) + eps)
# Inputs are lane/contraction padded to (Dp, Kp); padded rows are forced to a
# huge negative logit so they contribute exact zeros to the axis-0 softmax,
# padded columns are zeroed afterwards. Also emits the bf16 copy for the MXU.
# ---------------------------------------------------------------------------
def _gumbel_softmax_kernel(alpha_ref, u_ref, m_ref, m_mxu_ref, *,
                           inv_temperature, d_rows, k_cols):
    eps = jnp.float32(1e-20)
    shape = alpha_ref.shape
    row = jax.lax.broadcasted_iota(jnp.int32, shape, 0)
    col = jax.lax.broadcasted_iota(jnp.int32, shape, 1)

    g = -jnp.log(-jnp.log(u_ref[...] + eps) + eps)            # Gumbel noise
    y = (alpha_ref[...] + g) * jnp.float32(inv_temperature)
    # Padded rows -> -1e30 so exp underflows to exactly 0 (softmax over dim 0
    # of the real rows is unchanged).
    y = jnp.where(row < d_rows, y, jnp.float32(-1e30))
    y = y - jnp.max(y, axis=0, keepdims=True)                  # stable softmax
    e = jnp.exp(y)
    m = e / jnp.sum(e, axis=0, keepdims=True)                  # exact (runs once)
    m = jnp.where(col < k_cols, m, jnp.float32(0.0))           # zero lane padding
    m_ref[...] = m
    m_mxu_ref[...] = m.astype(m_mxu_ref.dtype)                 # fused MXU cast


# ---------------------------------------------------------------------------
# Kernel B: per-batch-tile feature selection + decoder
#   z = x @ m (accumulated over D tiles); rec = ReLU(z @ W1 + b1) @ W2 + b2
# Grid = (batch_tiles, d_tiles); d is the inner "arbitrary" reduction axis.
# Weights / mask stay resident; x, z, rec stream per batch tile.
# ---------------------------------------------------------------------------
def _decoder_kernel(x_ref, m_ref, w1_ref, b1_ref, w2_ref, b2_ref,
                    rec_ref, z_ref, acc_ref):
    d = pl.program_id(1)
    dt = w1_ref.dtype

    @pl.when(d == 0)
    def _():
        acc_ref[...] = jnp.zeros_like(acc_ref)

    acc_ref[...] += jnp.dot(x_ref[...].astype(dt), m_ref[...],
                            preferred_element_type=jnp.float32)

    @pl.when(d == pl.num_programs(1) - 1)
    def _():
        z = acc_ref[...]
        z_ref[...] = z
        h = jnp.dot(z.astype(dt), w1_ref[...],
                    preferred_element_type=jnp.float32) + b1_ref[...]
        h = jnp.maximum(h, 0.0)
        rec_ref[...] = (jnp.dot(h.astype(dt), w2_ref[...],
                                preferred_element_type=jnp.float32) + b2_ref[...])


def concrete_autoencoder_forward(x, alpha, uniform_noise, w1, b1, w2, b2,
                                 temperature, *,
                                 mxu_dtype=jnp.bfloat16,
                                 vmem_budget_bytes=None,
                                 x_buffers=2):
    """x:(B,D) f32; alpha/uniform_noise:(D,K); w1:(K,H); b1:(H,); w2:(H,O); b2:(O,).

    Decoder weights are stored already-transposed as (in, out), so the kernel
    does plain z @ W + b (same math as torch's x @ W.T + b).
    Returns (reconstruction (B,O), z (B,K), m (D,K)), all f32.
    `x_buffers` can be raised to 3 on v5e if the x DMA shows up exposed.
    """
    f32 = jnp.float32
    B, D = x.shape
    _, K = alpha.shape
    H = w1.shape[1]
    O = w2.shape[1]

    Kp = _round_up(K, _LANE)
    Hp = _round_up(H, _LANE)
    Op = _round_up(O, _LANE)
    Dp0 = _round_up(D, _LANE)

    wb = jnp.dtype(mxu_dtype).itemsize
    have_pm = _supports_pipeline_mode()

    cap = _vmem_capacity_bytes()
    budget = int(vmem_budget_bytes) if vmem_budget_bytes else int(cap * 0.85)

    # Resident decoder weights (single-buffered when pipeline_mode is available).
    res_buf = 1 if have_pm else 2
    resident = res_buf * (Kp * Hp * wb + Hp * Op * wb + 4 * Hp + 4 * Op)

    # ---- D (contraction) tiling: keep the mask's VMEM footprint bounded ----
    m_budget = max(budget // 3, 2 * _LANE * Kp * wb)
    if Dp0 * Kp * wb * res_buf <= m_budget:
        n_d, tD = 1, Dp0
    else:
        tD = max(_LANE, (m_budget // (2 * Kp * wb)) // _LANE * _LANE)
        n_d = pl.cdiv(Dp0, tD)
    Dp = n_d * tD
    m_buffers = (1 if have_pm else 2) if n_d == 1 else 2
    m_bytes = m_buffers * tD * Kp * wb

    # ---- batch tile: biggest balanced tile that fits; >=2 tiles for megacore ----
    per_row = ((4 * x_buffers + 2) * tD     # x stream (f32, pipelined) + bf16 copy
               + 14 * Kp                    # z out (2x f32) + f32 acc + bf16 copy
               + 6 * Hp                     # h f32 + h bf16
               + 8 * Op)                    # rec out (2x f32)
    avail = max(budget - resident - m_bytes, 8 * per_row)
    tb_max = 8
    for cand in (2048, 1024, 512, 256, 128, 64, 32, 16, 8):
        if cand * per_row <= avail:
            tb_max = cand
            break

    min_tiles = 2 if B >= 16 else 1         # keep both v7x TensorCores busy
    n_tiles = max(pl.cdiv(B, tb_max), min_tiles)
    tb = _round_up(pl.cdiv(B, n_tiles), _SUBLANE)
    n_tiles = max(pl.cdiv(B, tb), min_tiles)
    B_p = n_tiles * tb

    # ---------------- Kernel A: Gumbel-softmax mask (once) ----------------
    inv_t = 1.0 / float(temperature)        # baked in as a compile-time constant
    alpha_p = _pad2d(alpha.astype(f32), (Dp, Kp))
    u_p = _pad2d(uniform_noise.astype(f32), (Dp, Kp))

    vmem = pl.BlockSpec(memory_space=pltpu.MemorySpace.VMEM)

    m_p, m_mxu = pl.pallas_call(
        functools.partial(_gumbel_softmax_kernel,
                          inv_temperature=inv_t, d_rows=D, k_cols=K),
        out_shape=(jax.ShapeDtypeStruct((Dp, Kp), f32),      # m (returned)
                   jax.ShapeDtypeStruct((Dp, Kp), mxu_dtype)),  # m for the MXU
        in_specs=[vmem, vmem],
        out_specs=(vmem, vmem),
        cost_estimate=pl.CostEstimate(
            flops=8 * Dp * Kp,
            transcendentals=3 * Dp * Kp,
            bytes_accessed=(4 + 4 + 4 + wb) * Dp * Kp),
    )(alpha_p, u_p)

    # ------------- operands for the batched decoder -------------
    w1_p = _pad2d(w1.astype(f32), (Kp, Hp)).astype(mxu_dtype)
    w2_p = _pad2d(w2.astype(f32), (Hp, Op)).astype(mxu_dtype)
    b1_p = _pad2d(b1.astype(f32).reshape(1, H), (1, Hp))
    b2_p = _pad2d(b2.astype(f32).reshape(1, O), (1, Op))
    x_p = _pad2d(x.astype(f32), (B_p, Dp))   # lane-dense contraction dim

    def spec(shape, index_map, buffers):
        if have_pm:
            return pl.BlockSpec(shape, index_map,
                                pipeline_mode=pl.Buffered(buffers))
        return pl.BlockSpec(shape, index_map)

    needed = resident + m_bytes + tb * per_row + (4 << 20)
    vmem_limit = int(min(cap - (1 << 20), max(needed, 32 << 20)))

    flops = 2 * B_p * (Dp * Kp + Kp * Hp + Hp * Op)
    bytes_accessed = (B_p * Dp * 4 + Dp * Kp * wb + Kp * Hp * wb + Hp * Op * wb
                      + 4 * (Hp + Op) + B_p * (Op + Kp) * 4)

    rec_p, z_p = pl.pallas_call(
        _decoder_kernel,
        out_shape=(jax.ShapeDtypeStruct((B_p, Op), f32),   # reconstruction
                   jax.ShapeDtypeStruct((B_p, Kp), f32)),  # z
        grid=(n_tiles, n_d),
        in_specs=[
            spec((tb, tD), lambda i, d: (i, d), x_buffers),   # x   (streamed)
            spec((tD, Kp), lambda i, d: (d, 0), m_buffers),   # m   (resident / D-tiled)
            spec((Kp, Hp), lambda i, d: (0, 0), 1),           # W1  (resident)
            spec((1, Hp), lambda i, d: (0, 0), 1),            # b1  (resident)
            spec((Hp, Op), lambda i, d: (0, 0), 1),           # W2  (resident)
            spec((1, Op), lambda i, d: (0, 0), 1),            # b2  (resident)
        ],
        out_specs=(
            pl.BlockSpec((tb, Op), lambda i, d: (i, 0)),      # rec (streamed)
            pl.BlockSpec((tb, Kp), lambda i, d: (i, 0)),      # z   (streamed)
        ),
        scratch_shapes=[pltpu.VMEM((tb, Kp), jnp.float32)],   # z accumulator
        compiler_params=pltpu.CompilerParams(
            dimension_semantics=("parallel", "arbitrary"),
            vmem_limit_bytes=vmem_limit),
        cost_estimate=pl.CostEstimate(
            flops=flops, transcendentals=0, bytes_accessed=bytes_accessed),
    )(x_p, m_mxu, w1_p, b1_p, w2_p, b2_p)

    # Slice away batch / lane / contraction padding.
    rec = rec_p[:B, :O]
    z = z_p[:B, :K]
    m = m_p[:D, :K]
    return rec, z, m


def _reference_forward(x, alpha, uniform_noise, w1, b1, w2, b2, temperature):
    eps = 1e-20
    g = -jnp.log(-jnp.log(uniform_noise + eps) + eps)
    m = jax.nn.softmax((alpha + g) / temperature, axis=0)
    z = x @ m
    h = jnp.maximum(z @ w1 + b1, 0.0)
    rec = h @ w2 + b2
    return rec, z, m


if __name__ == "__main__":
    # Small shapes consistent with the module.
    batch, input_dim, k, hidden_dim, out_dim = 8, 32, 16, 32, 32
    temperature = 0.5

    key = jax.random.PRNGKey(0)
    kx, ka, ku, kw1, kb1, kw2, kb2 = jax.random.split(key, 7)

    x = jax.random.normal(kx, (batch, input_dim), dtype=jnp.float32)

    # Deterministic parameter init (shapes from __init__):
    alpha = jax.random.uniform(ka, (input_dim, k), dtype=jnp.float32)
    # Decoder Linear weights stored as (in, out) == torch weight transposed.
    w1 = jax.random.normal(kw1, (k, hidden_dim), dtype=jnp.float32) * (1.0 / k ** 0.5)
    b1 = jax.random.normal(kb1, (hidden_dim,), dtype=jnp.float32) * 0.01
    w2 = jax.random.normal(kw2, (hidden_dim, out_dim), dtype=jnp.float32) * (1.0 / hidden_dim ** 0.5)
    b2 = jax.random.normal(kb2, (out_dim,), dtype=jnp.float32) * 0.01

    # Uniform samples for the Gumbel noise (torch.rand(alpha.size())),
    # generated deterministically here and fed to the kernel.
    uniform_noise = jax.random.uniform(ku, (input_dim, k), dtype=jnp.float32)

    rec, z, m = concrete_autoencoder_forward(
        x, alpha, uniform_noise, w1, b1, w2, b2, temperature)
    jax.block_until_ready((rec, z, m))

    # Correctness check vs. pure-f32 JAX reference.
    rec_r, z_r, m_r = _reference_forward(
        x, alpha, uniform_noise, w1, b1, w2, b2, temperature)

    assert rec.shape == (batch, out_dim)
    assert z.shape == (batch, k)
    assert m.shape == (input_dim, k)
    # m uses exact f32 softmax; z / rec use bf16 MXU inputs with f32 accumulation,
    # so their tolerances are relaxed vs. the f32 reference.
    assert jnp.allclose(m, m_r, atol=1e-5, rtol=1e-5), float(jnp.max(jnp.abs(m - m_r)))
    assert jnp.allclose(z, z_r, atol=3e-2, rtol=3e-2), float(jnp.max(jnp.abs(z - z_r)))
    assert jnp.allclose(rec, rec_r, atol=5e-2, rtol=5e-2), float(jnp.max(jnp.abs(rec - rec_r)))

    print("KERNEL_OK")
</pallas_src>

<mosaic_0001>
module attributes {stable_mosaic.version = 11 : i64} {
  func.func @_gumbel_softmax_kernel(%arg0: memref<128x128xf32, #tpu.memory_space<vmem>>, %arg1: memref<128x128xf32, #tpu.memory_space<vmem>>, %arg2: memref<128x128xf32, #tpu.memory_space<vmem>>, %arg3: memref<128x128xbf16, #tpu.memory_space<vmem>>) attributes {dimension_semantics = [], scalar_prefetch = 0 : i64, scratch_operands = 0 : i64, tpu.core_type = #tpu.core_type<tc>} {
    %0 = tpu.iota {dimensions = array<i32: 0>} : vector<128x128xi32>
    %1 = tpu.iota {dimensions = array<i32: 1>} : vector<128x128xi32>
    %c0 = arith.constant 0 : index
    %c0_0 = arith.constant 0 : index
    %2 = vector.load %arg1[%c0, %c0_0] : memref<128x128xf32, #tpu.memory_space<vmem>>, vector<128x128xf32>
    %cst = arith.constant 9.99999968E-21 : f32
    %3 = vector.broadcast %cst : f32 to vector<128x128xf32>
    %4 = arith.addf %2, %3 : vector<128x128xf32>
    %5 = math.log %4 : vector<128x128xf32>
    %cst_1 = arith.constant 0.000000e+00 : f32
    %6 = vector.broadcast %cst_1 : f32 to vector<128x128xf32>
    %7 = arith.subf %6, %5 : vector<128x128xf32>
    %cst_2 = arith.constant 9.99999968E-21 : f32
    %8 = vector.broadcast %cst_2 : f32 to vector<128x128xf32>
    %9 = arith.addf %7, %8 : vector<128x128xf32>
    %10 = math.log %9 : vector<128x128xf32>
    %cst_3 = arith.constant 0.000000e+00 : f32
    %11 = vector.broadcast %cst_3 : f32 to vector<128x128xf32>
    %12 = arith.subf %11, %10 : vector<128x128xf32>
    %c0_4 = arith.constant 0 : index
    %c0_5 = arith.constant 0 : index
    %13 = vector.load %arg0[%c0_4, %c0_5] : memref<128x128xf32, #tpu.memory_space<vmem>>, vector<128x128xf32>
    %14 = arith.addf %13, %12 : vector<128x128xf32>
    %cst_6 = arith.constant 2.000000e+00 : f32
    %15 = vector.broadcast %cst_6 : f32 to vector<128x128xf32>
    %16 = arith.mulf %14, %15 : vector<128x128xf32>
    %c32_i32 = arith.constant 32 : i32
    %17 = vector.broadcast %c32_i32 : i32 to vector<128x128xi32>
    %18 = arith.cmpi slt, %0, %17 : vector<128x128xi32>
    %cst_7 = arith.constant -1.000000e+30 : f32
    %19 = vector.broadcast %cst_7 : f32 to vector<128x128xf32>
    %20 = arith.select %18, %16, %19 : vector<128x128xi1>, vector<128x128xf32>
    %cst_8 = arith.constant dense<0xFF800000> : vector<128xf32>
    %21 = vector.multi_reduction <maximumf>, %20, %cst_8 [0] : vector<128x128xf32> to vector<128xf32>
    %22 = vector.shape_cast %21 : vector<128xf32> to vector<1x128xf32>
    %23 = vector.broadcast %22 : vector<1x128xf32> to vector<128x128xf32>
    %24 = arith.subf %20, %23 : vector<128x128xf32>
    %25 = math.exp %24 : vector<128x128xf32>
    %cst_9 = arith.constant dense<0.000000e+00> : vector<128xf32>
    %26 = vector.multi_reduction <add>, %25, %cst_9 [0] : vector<128x128xf32> to vector<128xf32>
    %27 = vector.shape_cast %26 : vector<128xf32> to vector<1x128xf32>
    %28 = vector.broadcast %27 : vector<1x128xf32> to vector<128x128xf32>
    %29 = arith.divf %25, %28 : vector<128x128xf32>
    %c16_i32 = arith.constant 16 : i32
    %30 = vector.broadcast %c16_i32 : i32 to vector<128x128xi32>
    %31 = arith.cmpi slt, %1, %30 : vector<128x128xi32>
    %cst_10 = arith.constant 0.000000e+00 : f32
    %32 = vector.broadcast %cst_10 : f32 to vector<128x128xf32>
    %33 = arith.select %31, %29, %32 : vector<128x128xi1>, vector<128x128xf32>
    %c0_11 = arith.constant 0 : index
    %c0_12 = arith.constant 0 : index
    %34 = vector.load %arg2[%c0_11, %c0_12] : memref<128x128xf32, #tpu.memory_space<vmem>>, vector<128x128xf32>
    tpu.vector_store %arg2[%c0_11, %c0_12], %33 {strides = array<i32>} : memref<128x128xf32, #tpu.memory_space<vmem>>, vector<128x128xf32>,
    %35 = arith.truncf %33 : vector<128x128xf32> to vector<128x128xbf16>
    %c0_13 = arith.constant 0 : index
    %c0_14 = arith.constant 0 : index
    %36 = vector.load %arg3[%c0_13, %c0_14] : memref<128x128xbf16, #tpu.memory_space<vmem>>, vector<128x128xbf16>
    tpu.vector_store %arg3[%c0_13, %c0_14], %35 {strides = array<i32>} : memref<128x128xbf16, #tpu.memory_space<vmem>>, vector<128x128xbf16>,
    return
  }
}

</mosaic_0001>

<bundles_post_ra>
// kernel: tpu_custom_call.1
= control target key start
LH: loop header
LB: loop body
LE: loop exit
PB: predicated region body
PF: predicated region fallthrough
CT: control target
= control target key end

     0   :  { %9 = vsyncpa [#allocation3], 0  ;;  %s749_s0 = inlined_call_operand.hbm [shape: f32[128,128], index: 0, kind: input, shape index: {}]   ;;  %s750_s1 = inlined_call_operand.hbm [shape: f32[128,128], index: 1, kind: input, shape index: {}]   ;;  %s751_s2 = inlined_call_operand.hbm [shape: f32[128,128], index: 2, kind: output, shape index: {0}]   ;;  %s752_s3 = inlined_call_operand.hbm [shape: bf16[128,128], index: 3, kind: output, shape index: {1}]  }
   0x1   :  { %10 = vsyncpa [#allocation6], 0 }
   0x2   :  { %11 = vsyncpa [#allocation4], 0 }
   0x3   :  { %12 = vsyncpa [#allocation9], 0  ;;  %s17_s14 = sshll.u32 %s749_s0, 4  ;;  %s700_s15 = smov [#allocation2]   ;;  %s18_s14 = int_to_ptr.hbm [resolvable:$true] %s17_s14 }
   0x4   :  { %s19_s16 = sshll.u32 %s700_s15, 4  ;;  %s30_s19 = sshll.u32 %s750_s1, 4  ;;  %s20_s16 = int_to_ptr.vmem [resolvable:$true] %s19_s16  ;;  %s31_s19 = int_to_ptr.hbm [resolvable:$true] %s30_s19 }
   0x5   :  { %s701_s20 = smov 128   ;;  %s702_s21 = smov 8  }
   0x6   :  { %25 = dma.hbm_to_vmem [thread:$0]  %s18_s14, 2048, %s20_s16, [#allocation3], %s701_s20, %s701_s20, %s702_s21  }
   0x7   :  { %s703_s22 = smov [#allocation5]  }
   0x8   :  { %s32_s23 = sshll.u32 %s703_s22, 4  ;;  %s33_s23 = int_to_ptr.vmem [resolvable:$true] %s32_s23 }
   0x9   :  { %38 = dma.hbm_to_vmem [thread:$0]  %s31_s19, 2048, %s33_s23, [#allocation6], %s701_s20, %s701_s20, %s702_s21  }
   0xa   :  { %692 = dma.done.wait [#allocation3], 2048  }
   0xb   :  { %693 = vsyncadd [#allocation3], 4294965248 }
   0xc   :  { %694 = dma.done.wait [#allocation6], 2048  }
   0xd   :  { %695 = vsyncadd [#allocation6], 4294965248  ;;  %v66_v0 = vld [vmem:[#allocation5] sm:$0xff]  ;;  %v67_v1 = vld [vmem:[#allocation5 + $0x8] sm:$0xff]  ;;  %s704_s0 = smov [#allocation7]   ;;  %s481_s26 = sshll.u32 %s751_s2, 4  ;;  %s482_s26 = int_to_ptr.hbm [resolvable:$true] %s481_s26 }
   0xe   :  { %v68_v2 = vld [vmem:[#allocation5 + $0x10] sm:$0xff]  ;;  %v69_v3 = vld [vmem:[#allocation5 + $0x18] sm:$0xff]  ;;  %v82_v4 = vadd.f32 1e-20, %v66_v0  ;;  %v83_v5 = vadd.f32 1e-20, %v67_v1 }
   0xf   :  { %v84_v6 = vadd.f32 1e-20, %v68_v2  ;;  %v85_v7 = vadd.f32 1e-20, %v69_v3  ;;  %v210_v29 = vld [vmem:[#allocation2] sm:$0xff]  ;;  %v211_v33 = vld [vmem:[#allocation2 + $0x8] sm:$0xff] }
  0x10   :  { %568 = vlog2.f32 %v82_v4  ;;  %v212_v36 = vld [vmem:[#allocation2 + $0x10] sm:$0xff]  ;;  %v213_v38 = vld [vmem:[#allocation2 + $0x18] sm:$0xff]  ;;  %s479_s1 = sshll.u32 %s704_s0, 4  ;;  %s705_s27 = smov [#allocation8]   ;;  %s480_s1 = int_to_ptr.vmem [resolvable:$true] %s479_s1 }
  0x11   :  { %570 = vlog2.f32 %v83_v5  ;;  %s492_s28 = sshll.u32 %s705_s27, 4  ;;  %s494_s2 = sshll.u32 %s752_s3, 4  ;;  %s493_s28 = int_to_ptr.vmem [resolvable:$true] %s492_s28  ;;  %s495_s2 = int_to_ptr.hbm [resolvable:$true] %s494_s2 }
  0x12   :  { %572 = vlog2.f32 %v84_v6  ;;  %s706_s4 = smov 64   ;;  %s707_s5 = smov 4  }
  0x13   :  { %574 = vlog2.f32 %v85_v7 }
  0x16   :  { %v569_v8 = vpop.eup %568 }
  0x17   :  { %v571_v9 = vpop.eup %570  ;;  %v99_v10 = vmul.f32 0.6931472, %v569_v8 }
  0x18   :  { %v573_v11 = vpop.eup %572  ;;  %v101_v12 = vmul.f32 0.6931472, %v571_v9 }
  0x19   :  { %v575_v13 = vpop.eup %574  ;;  %v103_v14 = vmul.f32 0.6931472, %v573_v11  ;;  %v130_v15 = vsub.f32 0.0, %v99_v10 }
  0x1a   :  { %v105_v16 = vmul.f32 0.6931472, %v575_v13  ;;  %v131_v17 = vsub.f32 0.0, %v101_v12 }
  0x1b   :  { %v132_v18 = vsub.f32 0.0, %v103_v14  ;;  %v146_v19 = vadd.f32 1e-20, %v130_v15 }
  0x1c   :  { %v133_v20 = vsub.f32 0.0, %v105_v16  ;;  %v147_v21 = vadd.f32 1e-20, %v131_v17 }
  0x1d   :  { %v148_v22 = vadd.f32 1e-20, %v132_v18  ;;  %576 = vlog2.f32 %v146_v19 }
  0x1e   :  { %v149_v23 = vadd.f32 1e-20, %v133_v20  ;;  %578 = vlog2.f32 %v147_v21 }
  0x1f   :  { %580 = vlog2.f32 %v148_v22 }
  0x20   :  { %582 = vlog2.f32 %v149_v23 }
  0x23   :  { %v577_v24 = vpop.eup %576 }
  0x24   :  { %v579_v25 = vpop.eup %578  ;;  %v163_v26 = vmul.f32 0.6931472, %v577_v24 }
  0x25   :  { %v581_v27 = vpop.eup %580  ;;  %v165_v28 = vmul.f32 0.6931472, %v579_v25 }
  0x26   :  { %v583_v30 = vpop.eup %582  ;;  %v167_v31 = vmul.f32 0.6931472, %v581_v27  ;;  %v194_v32 = vsub.f32 0.0, %v163_v26 }
  0x27   :  { %v169_v34 = vmul.f32 0.6931472, %v583_v30  ;;  %v195_v35 = vsub.f32 0.0, %v165_v28 }
  0x28   :  { %v196_v37 = vsub.f32 0.0, %v167_v31  ;;  %v226_v39 = vadd.f32 %v210_v29, %v194_v32 }
  0x29   :  { %v197_v40 = vsub.f32 0.0, %v169_v34  ;;  %v227_v41 = vadd.f32 %v211_v33, %v195_v35 }
  0x2a   :  { %v228_v42 = vadd.f32 %v212_v36, %v196_v37  ;;  %v242_v43 = vmul.f32 2.0, %v226_v39 }
  0x2b   :  { %v229_v44 = vadd.f32 %v213_v38, %v197_v40  ;;  %v243_v45 = vmul.f32 2.0, %v227_v41 }
  0x2c   :  { %v244_v46 = vmul.f32 2.0, %v228_v42  ;;  %v290_v47 = vmax.f32 %v242_v43, -1e+30 }
  0x2d   :  { %v245_v48 = vmul.f32 2.0, %v229_v44  ;;  %v291_v49 = vmax.f32 %v243_v45, -1e+30 }
  0x2e   :  { %v292_v50 = vmax.f32 %v244_v46, -1e+30  ;;  %v294_v51 = vmax.f32 %v290_v47, -1e+30 }
  0x2f   :  { %v293_v52 = vmax.f32 %v245_v48, -1e+30  ;;  %v295_v53 = vmax.f32 %v291_v49, -1e+30 }
  0x30   :  { %v296_v54 = vmax.f32 %v292_v50, -1e+30  ;;  %v298_v55 = vmax.f32 %v294_v51, -1e+30 }
  0x31   :  { %v297_v56 = vmax.f32 %v293_v52, -1e+30  ;;  %v299_v57 = vmax.f32 %v295_v53, -1e+30 }
  0x32   :  { %v300_v58 = vmax.f32 %v296_v54, -1e+30 }
  0x33   :  { %v301_v59 = vmax.f32 %v297_v56, -1e+30  ;;  %v302_v60 = vmax.f32 %v298_v55, %v299_v57 }
  0x35   :  { %v303_v61 = vmax.f32 %v300_v58, %v301_v59 }
  0x37   :  { %v304_v62 = vmax.f32 %v302_v60, %v303_v61 }
  0x39   :  { %v305_v63 = vrot.slane %v304_v62, 4 }
  0x3b   :  { %v306_v0 = vmax.f32 %v304_v62, %v305_v63 }
  0x3d   :  { %v307_v1 = vrot.slane %v306_v0, 2 }
  0x3f   :  { %v308_v2 = vmax.f32 %v306_v0, %v307_v1 }
  0x41   :  { %v309_v3 = vrot.slane %v308_v2, 1 }
  0x43   :  { %v310_v4 = vmax.f32 %v308_v2, %v309_v3 }
  0x45   :  { %v311_v5 = vsub.f32 %v242_v43, %v310_v4  ;;  %v312_v6 = vsub.f32 %v243_v45, %v310_v4  ;;  %v313_v7 = vsub.f32 %v244_v46, %v310_v4  ;;  %v314_v8 = vsub.f32 %v245_v48, %v310_v4 }
  0x46   :  { %v315_v9 = vsub.f32 -1e+30, %v310_v4  ;;  %v64_v43 = vlaneseq }
  0x47   :  { %v327_v10 = vmul.f32 1.442695, %v311_v5  ;;  %v329_v11 = vmul.f32 1.442695, %v312_v6  ;;  %v331_v12 = vmul.f32 1.442695, %v313_v7 }
  0x48   :  { %v333_v13 = vmul.f32 1.442695, %v314_v8  ;;  %v335_v14 = vmul.f32 1.442695, %v315_v9  ;;  %v65_v48 = vand.u32 127, %v64_v43 }
  0x49   :  { %584 = vpow2.f32 %v327_v10 }
  0x4a   :  { %586 = vpow2.f32 %v329_v11  ;;  %vm410_vm4 = vcmp.lt.s32.totalorder %v65_v48, 16 }
  0x4b   :  { %588 = vpow2.f32 %v331_v12 }
  0x4c   :  { %590 = vpow2.f32 %v333_v13 }
  0x4d   :  { %592 = vpow2.f32 %v335_v14 }
  0x4f   :  { %v585_v15 = vpop.eup %584 }
  0x50   :  { %v587_v16 = vpop.eup %586 }
  0x51   :  { %v589_v17 = vpop.eup %588  ;;  %v359_v18 = vadd.f32 %v587_v16, %v585_v15 }
  0x52   :  { %v591_v19 = vpop.eup %590 }
  0x53   :  { %v360_v20 = vadd.f32 %v589_v17, %v359_v18  ;;  %v593_v21 = vpop.eup %592 }
  0x55   :  { %v361_v22 = vadd.f32 %v591_v19, %v360_v20 }
  0x57   :  { %v362_v23 = vadd.f32 %v593_v21, %v361_v22 }
  0x59   :  { %v363_v24 = vadd.f32 %v593_v21, %v362_v23 }
  0x5b   :  { %v364_v25 = vadd.f32 %v593_v21, %v363_v24 }
  0x5d   :  { %v365_v26 = vadd.f32 %v593_v21, %v364_v25 }
  0x5f   :  { %v366_v27 = vadd.f32 %v593_v21, %v365_v26 }
  0x61   :  { %v367_v28 = vadd.f32 %v593_v21, %v366_v27 }
  0x63   :  { %v368_v29 = vadd.f32 %v593_v21, %v367_v28 }
  0x65   :  { %v369_v30 = vadd.f32 %v593_v21, %v368_v29 }
  0x67   :  { %v370_v31 = vadd.f32 %v593_v21, %v369_v30 }
  0x69   :  { %v371_v32 = vadd.f32 %v593_v21, %v370_v31 }
  0x6b   :  { %v372_v33 = vadd.f32 %v593_v21, %v371_v32 }
  0x6d   :  { %v373_v34 = vadd.f32 %v593_v21, %v372_v33 }
  0x6f   :  { %v374_v35 = vrot.slane %v373_v34, 4 }
  0x71   :  { %v375_v36 = vadd.f32 %v374_v35, %v373_v34 }
  0x73   :  { %v376_v37 = vrot.slane %v375_v36, 2 }
  0x75   :  { %v377_v38 = vadd.f32 %v376_v37, %v375_v36 }
  0x77   :  { %v378_v39 = vrot.slane %v377_v38, 1 }
  0x79   :  { %v379_v40 = vadd.f32 %v378_v39, %v377_v38 }
  0x7b   :  { %594 = vrcp.f32 %v379_v40  ;;  %v391_v44 = vand.u32 2147483648, %v379_v40  ;;  %vm385_vm0 = vweird.f32 %v379_v40  ;;  %v389_v46 = vand.u32 2147483647, %v379_v40 }
  0x7d   :  { %v392_v49 = vor.u32 1.1754944e-38, %v391_v44  ;;  %vm390_vm3 = vcmp.eq.f32.partialorder %v389_v46, 8.507059e+37 }
  0x81   :  { %v595_v41 = vpop.eup %594 }
  0x82   :  { %v381_v42 = vmul.f32 %v595_v41, %v379_v40  ;;  %vm386_vm1 = vweird.f32 %v595_v41 }
  0x83   :  { %vm387_vm2 = vmor %vm385_vm0, %vm386_vm1 }
  0x84   :  { %v382_v45 = vsub.f32 1.0, %v381_v42 }
  0x86   :  { %v383_v47 = vmul.f32 %v595_v41, %v382_v45 }
  0x88   :  { %v384_v50 = vadd.f32 %v595_v41, %v383_v47 }
  0x8a   :  { %v388_v51 = vsel %vm387_vm2, %v595_v41, %v384_v50 }
  0x8b   :  { %v393_v52 = vsel %vm390_vm3, %v392_v49, %v388_v51 }
  0x8c   :  { %v394_v53 = vmul.f32 %v585_v15, %v393_v52  ;;  %v398_v54 = vmul.f32 %v593_v21, %v393_v52  ;;  %v395_v55 = vmul.f32 %v587_v16, %v393_v52  ;;  %v396_v56 = vmul.f32 %v589_v17, %v393_v52 }
  0x8d   :  { %v397_v57 = vmul.f32 %v591_v19, %v393_v52 }
  0x8e   :  { %v411_v58 = vsel %vm410_vm4, %v394_v53, 0.0  ;;  %v412_v59 = vsel %vm410_vm4, %v395_v55, 0.0  ;;  %v413_v60 = vsel %vm410_vm4, %v396_v56, 0.0  ;;  %v415_v61 = vsel %vm410_vm4, %v398_v54, 0.0 }
  0x8f   :  { %427 = vst [vmem:[#allocation7] sm:$0xff] %v411_v58  ;;  %v414_v62 = vsel %vm410_vm4, %v397_v57, 0.0  ;;  %v516_v63 = vpack.c.bf16 %v412_v59, %v411_v58  ;;  %v526_v1 = vpack.c.bf16 %v415_v61, %v415_v61 }
  0x90   :  { %431 = vst [vmem:[#allocation7 + $0x20] sm:$0xff] %v415_v61  ;;  %v521_v0 = vpack.c.bf16 %v414_v62, %v413_v60 }
  0x91   :  { %432 = vst [vmem:[#allocation7 + $0x28] sm:$0xff] %v415_v61 }
  0x92   :  { %433 = vst [vmem:[#allocation7 + $0x30] sm:$0xff] %v415_v61 }
  0x93   :  { %434 = vst [vmem:[#allocation7 + $0x38] sm:$0xff] %v415_v61 }
  0x94   :  { %435 = vst [vmem:[#allocation7 + $0x40] sm:$0xff] %v415_v61 }
  0x95   :  { %436 = vst [vmem:[#allocation7 + $0x48] sm:$0xff] %v415_v61 }
  0x96   :  { %437 = vst [vmem:[#allocation7 + $0x50] sm:$0xff] %v415_v61 }
  0x97   :  { %438 = vst [vmem:[#allocation7 + $0x58] sm:$0xff] %v415_v61 }
  0x98   :  { %439 = vst [vmem:[#allocation7 + $0x60] sm:$0xff] %v415_v61 }
  0x99   :  { %440 = vst [vmem:[#allocation7 + $0x68] sm:$0xff] %v415_v61 }
  0x9a   :  { %441 = vst [vmem:[#allocation7 + $0x70] sm:$0xff] %v415_v61 }
  0x9b   :  { %442 = vst [vmem:[#allocation7 + $0x78] sm:$0xff] %v415_v61 }
  0x9c   :  { %428 = vst [vmem:[#allocation7 + $0x8] sm:$0xff] %v412_v59 }
  0x9d   :  { %429 = vst [vmem:[#allocation7 + $0x10] sm:$0xff] %v413_v60 }
  0x9e   :  { %430 = vst [vmem:[#allocation7 + $0x18] sm:$0xff] %v414_v62 }
  0x9f   :  { %517 = vst [vmem:[#allocation8] sm:$0xff] %v516_v63   ;;  %487 = dma.vmem_to_hbm [thread:$0]  %s480_s1, 2048, %s482_s26, [#allocation4], %s701_s20, %s701_s20, %s702_s21  }
  0xa0   :  { %553 = vst [vmem:[#allocation8 + $0x8] sm:$0xff] %v521_v0  }
  0xa1   :  { %554 = vst [vmem:[#allocation8 + $0x10] sm:$0xff] %v526_v1  }
  0xa2   :  { %555 = vst [vmem:[#allocation8 + $0x18] sm:$0xff] %v526_v1  }
  0xa3   :  { %556 = vst [vmem:[#allocation8 + $0x20] sm:$0xff] %v526_v1  }
  0xa4   :  { %557 = vst [vmem:[#allocation8 + $0x28] sm:$0xff] %v526_v1  }
  0xa5   :  { %558 = vst [vmem:[#allocation8 + $0x30] sm:$0xff] %v526_v1  }
  0xa6   :  { %559 = vst [vmem:[#allocation8 + $0x38] sm:$0xff] %v526_v1  }
  0xa7   :  { %500 = dma.vmem_to_hbm [thread:$0]  %s493_s28, 1024, %s495_s2, [#allocation9], %s706_s4, %s706_s4, %s707_s5  }
  0xa8   :  { %696 = dma.done.wait [#allocation4], 2048  }
  0xa9   :  { %697 = vsyncadd [#allocation4], 4294965248 }
  0xaa   :  { %698 = dma.done.wait [#allocation9], 1024  }
  0xab   :  { %699 = vsyncadd [#allocation9], 4294966272 }
  0xac   :  { %509 = vsyncpa [#allocation3], 1 }
  0xad   :  { %510 = vsyncpa [#allocation6], 1 }
  0xae   :  { %511 = vsyncpa [#allocation4], 1 }
  0xaf   :  { %512 = vsyncpa [#allocation9], 1 }

</bundles_post_ra>
